<compile_context>
chip_gen: v6e
topology: v6e:2x2x1
jax: 0.10.0
libtpu: 0.0.40
codegen_flags: <defaults>
</compile_context>

<pallas_src>
import jax
import jax.numpy as jnp
from jax.experimental import pallas as pl
from jax.experimental.pallas import tpu as pltpu

BN_EPS = 1e-5


def _round_up(v, m):
    return ((v + m - 1) // m) * m


# ----------------------------------------------------------------------------
# Kernel: dot + shift + relu, dot + shift + relu, residual add.
# Weights are pre-folded (BN scale into columns, BN shift + bias into per-layer shift rows).
# ----------------------------------------------------------------------------
def _linear_block_kernel(x_ref, w1_ref, w2_ref, shift_ref, o_ref):
    x = x_ref[...]                                                    # (bm, F) f32

    # layer 1: folded (linear + bias + eval-mode BN), then ReLU.  MXU, f32 accumulation.
    h = jnp.dot(x.astype(w1_ref.dtype), w1_ref[...],
                preferred_element_type=jnp.float32)                   # (bm, F) f32
    h = jnp.maximum(h + shift_ref[0:1, :], 0.0)                       # f32 elementwise (VPU)
    # dropout: identity in eval mode

    # layer 2: folded (linear + bias + eval-mode BN), then ReLU.
    h = jnp.dot(h.astype(w2_ref.dtype), w2_ref[...],
                preferred_element_type=jnp.float32)
    h = jnp.maximum(h + shift_ref[1:2, :], 0.0)
    # dropout: identity in eval mode

    # residual add
    o_ref[...] = (x + h).astype(o_ref.dtype)


# ----------------------------------------------------------------------------
# Generation-aware sizing helpers
# ----------------------------------------------------------------------------
def _tpu_info():
    """Best-effort (vmem_capacity_bytes, mxu_m, n_tensorcores) for the current TPU."""
    vmem = 64 * 1024 * 1024
    try:
        vmem = int(pltpu.get_tpu_info().vmem_capacity_bytes)
    except Exception:
        pass
    mxu_m, n_tc = 256, 1
    try:
        kind = jax.devices()[0].device_kind.lower()
        if ("v5 lite" in kind) or ("v5e" in kind) or ("v5lite" in kind):
            mxu_m = 128                     # v5e MXU is 4x128^2
        if "v7" in kind:
            n_tc = 2                        # v7x: 2 TensorCores per chip (megacore)
    except Exception:
        pass
    return vmem, mxu_m, n_tc


def _choose_block_m(n, requested, fit_rows, mxu_m, n_tc):
    """Row tile: as large as batch / VMEM allow, MXU-aligned; split only for v7x megacore."""
    n_pad = _round_up(max(n, 8), 8)
    bm = max(8, min(requested, n_pad, int(fit_rows)))
    if bm >= mxu_m:
        bm = (bm // mxu_m) * mxu_m          # feed the full MXU M dimension
    else:
        bm = max(8, (bm // 8) * 8)          # sublane alignment for small batches
    # v7x only: make >= 2 parallel grid steps so both TensorCores get work, and only when
    # each half still feeds the MXU with >= mxu_m rows.  (On v5e/v6e the grid is a sequential
    # loop on one TC — splitting just adds ~0.35 us/step overhead and shrinks matmul M.)
    if n_tc >= 2 and pl.cdiv(n_pad, bm) < 2 and n_pad >= 2 * mxu_m:
        half = _round_up(pl.cdiv(n_pad, 2), mxu_m)
        bm = max(mxu_m, min(bm, half))
    return bm


# ----------------------------------------------------------------------------
# Wrapper
# ----------------------------------------------------------------------------
def linear_block(x, w1f, w2f, shifts, block_m=1024, compute_dtype=jnp.bfloat16):
    """Residual Linear block forward. x: (N, F) f32; w1f/w2f: (F, F) folded; shifts: (2, F) f32."""
    N, F = x.shape
    w1f = w1f.astype(compute_dtype)
    w2f = w2f.astype(compute_dtype)
    wbytes = jnp.dtype(compute_dtype).itemsize

    vmem_cap, mxu_m, n_tc = _tpu_info()
    vmem_budget = int(0.88 * vmem_cap)              # headroom for compiler scratch

    weight_bytes = 2 * F * F * wbytes               # single-buffered resident folded weights
    shift_bytes = 2 * 8 * _round_up(F, 128) * 4     # tiny, padded generously
    row_bytes = 4 * F * 4                           # x + out tiles, double-buffered, f32
    avail = vmem_budget - weight_bytes - shift_bytes
    if avail < 8 * row_bytes:
        # TODO(synk): stream weight slabs (memory_space=pl.ANY + pltpu.emit_pipeline over
        # K/column blocks with an f32 accumulator) when both (F, F) weights don't fit VMEM.
        raise ValueError(
            f"resident-weight path needs ~{weight_bytes / 2**20:.1f} MiB of weights; does not "
            f"fit {vmem_budget / 2**20:.1f} MiB VMEM budget for F={F} ({jnp.dtype(compute_dtype)})")

    bm = _choose_block_m(N, block_m, avail // row_bytes, mxu_m, n_tc)

    vmem_need = 4 * bm * F * 4 + weight_bytes + shift_bytes
    vmem_limit = int(min(vmem_budget, max(32 * 1024 * 1024, int(1.5 * vmem_need))))

    cost = pl.CostEstimate(
        flops=4 * N * F * F,                                        # two (N,F)x(F,F) matmuls
        transcendentals=0,
        bytes_accessed=2 * N * F * 4 + 2 * F * F * wbytes + 2 * F * 4,
    )

    def build(single_buffer_const):
        # Weights / shifts use a constant index_map -> fetched once; Buffered(1) avoids the
        # default double-buffer allocation for them.
        pm = {"pipeline_mode": pl.Buffered(1)} if single_buffer_const else {}
        w_spec = pl.BlockSpec((F, F), lambda i: (0, 0), **pm)
        s_spec = pl.BlockSpec((2, F), lambda i: (0, 0), **pm)
        return pl.pallas_call(
            _linear_block_kernel,
            out_shape=jax.ShapeDtypeStruct((N, F), x.dtype),
            grid_spec=pltpu.PrefetchScalarGridSpec(
                num_scalar_prefetch=0,
                grid=(pl.cdiv(N, bm),),
                in_specs=[
                    pl.BlockSpec((bm, F), lambda i: (i, 0)),        # x row-tile
                    w_spec,                                         # folded w1 (resident)
                    w_spec,                                         # folded w2 (resident)
                    s_spec,                                         # stacked per-layer shifts
                ],
                out_specs=pl.BlockSpec((bm, F), lambda i: (i, 0)),
            ),
            compiler_params=pltpu.CompilerParams(
                dimension_semantics=("parallel",),
                vmem_limit_bytes=vmem_limit,
            ),
            cost_estimate=cost,
        )

    try:
        y = build(True)(x, w1f, w2f, shifts)
        return jax.block_until_ready(y)
    except Exception:
        # Fallback if this jax build rejects pipeline_mode=pl.Buffered(1) on BlockSpec.
        y = build(False)(x, w1f, w2f, shifts)
        return jax.block_until_ready(y)


# ----------------------------------------------------------------------------
# Parameters, folding, references
# ----------------------------------------------------------------------------
def init_params(key, linear_size):
    """Deterministic synthetic parameters (PyTorch-like shapes / init)."""
    F = linear_size
    ks = jax.random.split(key, 8)
    bound = 1.0 / jnp.sqrt(F)
    # nn.Linear weights are (out, in); we store the transpose (in, out) for x @ W^T.
    w1_t = jax.random.uniform(ks[0], (F, F), jnp.float32, -bound, bound)
    b1 = jax.random.uniform(ks[1], (1, F), jnp.float32, -bound, bound)
    w2_t = jax.random.uniform(ks[2], (F, F), jnp.float32, -bound, bound)
    b2 = jax.random.uniform(ks[3], (1, F), jnp.float32, -bound, bound)
    # BatchNorm1d: gamma=1, beta=0 at init; running stats made non-trivial for a real test.
    g1 = jnp.ones((1, F), jnp.float32)
    be1 = jnp.zeros((1, F), jnp.float32)
    m1 = 0.1 * jax.random.normal(ks[4], (1, F), jnp.float32)
    v1 = 1.0 + 0.1 * jax.random.uniform(ks[5], (1, F), jnp.float32)
    g2 = jnp.ones((1, F), jnp.float32)
    be2 = jnp.zeros((1, F), jnp.float32)
    m2 = 0.1 * jax.random.normal(ks[6], (1, F), jnp.float32)
    v2 = 1.0 + 0.1 * jax.random.uniform(ks[7], (1, F), jnp.float32)
    return (w1_t, b1, g1, be1, m1, v1, w2_t, b2, g2, be2, m2, v2)


def fold_params(params):
    """Fold eval-mode BatchNorm + Linear bias into column-scaled weights and a (2, F) shift."""
    (w1_t, b1, g1, be1, m1, v1, w2_t, b2, g2, be2, m2, v2) = params
    s1 = g1 * jax.lax.rsqrt(v1 + BN_EPS)                        # (1, F)
    s2 = g2 * jax.lax.rsqrt(v2 + BN_EPS)
    w1f = w1_t * s1                                             # scale output columns
    w2f = w2_t * s2
    shift1 = (b1 - m1) * s1 + be1
    shift2 = (b2 - m2) * s2 + be2
    shifts = jnp.concatenate([shift1, shift2], axis=0)          # (2, F)
    return w1f, w2f, shifts


def reference(x, params):
    """Pure-JAX f32 reference of the same eval-mode forward (unfused math, raw params)."""
    (w1_t, b1, g1, be1, m1, v1, w2_t, b2, g2, be2, m2, v2) = params
    h = x @ w1_t + b1
    h = (h - m1) * jax.lax.rsqrt(v1 + BN_EPS) * g1 + be1
    h = jnp.maximum(h, 0.0)
    h = h @ w2_t + b2
    h = (h - m2) * jax.lax.rsqrt(v2 + BN_EPS) * g2 + be2
    h = jnp.maximum(h, 0.0)
    return x + h


def folded_reference(x, w1f, w2f, shifts, compute_dtype):
    """Pure-JAX reference matching the kernel's quantization (weights/operands in compute_dtype,
    f32 accumulation and f32 elementwise)."""
    w1c = w1f.astype(compute_dtype)
    w2c = w2f.astype(compute_dtype)
    h = jnp.dot(x.astype(compute_dtype), w1c, preferred_element_type=jnp.float32)
    h = jnp.maximum(h + shifts[0:1, :], 0.0)
    h = jnp.dot(h.astype(compute_dtype), w2c, preferred_element_type=jnp.float32)
    h = jnp.maximum(h + shifts[1:2, :], 0.0)
    return x + h


if __name__ == "__main__":
    linear_size = 256   # feature dim (lane-aligned, multiple of 128)
    batch = 64          # small demo batch; bm auto-clamps to batch

    key = jax.random.PRNGKey(0)
    kx, kp = jax.random.split(key)
    x = jax.random.normal(kx, (batch, linear_size), jnp.float32)
    raw_params = init_params(kp, linear_size)
    w1f, w2f, shifts = fold_params(raw_params)

    # Default bf16-weight / f32-accumulation path.
    y = linear_block(x, w1f, w2f, shifts)
    y = jax.block_until_ready(y)

    # Tight check against a reference with identical bf16 quantization.
    y_matched = folded_reference(x, w1f, w2f, shifts, jnp.bfloat16)
    assert jnp.allclose(y, y_matched, atol=2e-3, rtol=2e-3), "mismatch vs matched bf16 reference"

    # Loose check against the full-precision module math (bf16 weight quantization error only).
    y_ref = reference(x, raw_params)
    assert jnp.allclose(y, y_ref, atol=5e-2, rtol=5e-2), "mismatch vs f32 reference (bf16 path)"

    # f32 compute path keeps the original tight tolerance.
    y32 = linear_block(x, w1f, w2f, shifts, compute_dtype=jnp.float32)
    y32 = jax.block_until_ready(y32)
    assert jnp.allclose(y32, y_ref, atol=1e-3, rtol=1e-3), "mismatch vs f32 reference (f32 path)"

    print("KERNEL_OK")
</pallas_src>

<mosaic_0001>
module attributes {stable_mosaic.version = 11 : i64} {
  func.func @_linear_block_kernel(%arg0: i32, %arg1: memref<64x256xf32, #tpu.memory_space<vmem>>, %arg2: memref<256x256xbf16, #tpu.memory_space<vmem>>, %arg3: memref<256x256xbf16, #tpu.memory_space<vmem>>, %arg4: memref<2x256xf32, #tpu.memory_space<vmem>>, %arg5: memref<64x256xf32, #tpu.memory_space<vmem>>) attributes {dimension_semantics = [#tpu.dimension_semantics<parallel>], iteration_bounds = array<i64: 1>, scalar_prefetch = 0 : i64, scratch_operands = 0 : i64, tpu.core_type = #tpu.core_type<tc>, window_params = [{transform_indices = @transform_0, window_bounds = array<i64: 64, 256>}, {pipeline_mode = #tpu.pipeline_mode<synchronous>, transform_indices = @transform_1, window_bounds = array<i64: 256, 256>}, {pipeline_mode = #tpu.pipeline_mode<synchronous>, transform_indices = @transform_2, window_bounds = array<i64: 256, 256>}, {pipeline_mode = #tpu.pipeline_mode<synchronous>, transform_indices = @transform_3, window_bounds = array<i64: 2, 256>}, {transform_indices = @transform_4, window_bounds = array<i64: 64, 256>}]} {
    %c0 = arith.constant 0 : index
    %c0_0 = arith.constant 0 : index
    %0 = vector.load %arg1[%c0, %c0_0] : memref<64x256xf32, #tpu.memory_space<vmem>>, vector<64x256xf32>
    %1 = arith.truncf %0 : vector<64x256xf32> to vector<64x256xbf16>
    %c0_1 = arith.constant 0 : index
    %c0_2 = arith.constant 0 : index
    %2 = vector.load %arg2[%c0_1, %c0_2] : memref<256x256xbf16, #tpu.memory_space<vmem>>, vector<256x256xbf16>
    %cst = arith.constant dense<0.000000e+00> : vector<64x256xf32>
    %3 = tpu.matmul %1, %2, %cst {dimension_numbers = #tpu.dot_dimension_numbers<[1], [0], [0], [1], [0, 0, 1, 1], [], []>} : vector<64x256xbf16>, vector<256x256xbf16>, vector<64x256xf32> -> vector<64x256xf32>
    %c0_3 = arith.constant 0 : index
    %c0_4 = arith.constant 0 : index
    %4 = vector.load %arg4[%c0_3, %c0_4] : memref<2x256xf32, #tpu.memory_space<vmem>>, vector<1x256xf32>
    %5 = vector.broadcast %4 : vector<1x256xf32> to vector<64x256xf32>
    %6 = arith.addf %3, %5 : vector<64x256xf32>
    %cst_5 = arith.constant 0.000000e+00 : f32
    %7 = vector.broadcast %cst_5 : f32 to vector<64x256xf32>
    %8 = arith.maximumf %6, %7 : vector<64x256xf32>
    %9 = arith.truncf %8 : vector<64x256xf32> to vector<64x256xbf16>
    %c0_6 = arith.constant 0 : index
    %c0_7 = arith.constant 0 : index
    %10 = vector.load %arg3[%c0_6, %c0_7] : memref<256x256xbf16, #tpu.memory_space<vmem>>, vector<256x256xbf16>
    %cst_8 = arith.constant dense<0.000000e+00> : vector<64x256xf32>
    %11 = tpu.matmul %9, %10, %cst_8 {dimension_numbers = #tpu.dot_dimension_numbers<[1], [0], [0], [1], [0, 0, 1, 1], [], []>} : vector<64x256xbf16>, vector<256x256xbf16>, vector<64x256xf32> -> vector<64x256xf32>
    %c1 = arith.constant 1 : index
    %c0_9 = arith.constant 0 : index
    %12 = vector.load %arg4[%c1, %c0_9] : memref<2x256xf32, #tpu.memory_space<vmem>>, vector<1x256xf32>
    %13 = vector.broadcast %12 : vector<1x256xf32> to vector<64x256xf32>
    %14 = arith.addf %11, %13 : vector<64x256xf32>
    %cst_10 = arith.constant 0.000000e+00 : f32
    %15 = vector.broadcast %cst_10 : f32 to vector<64x256xf32>
    %16 = arith.maximumf %14, %15 : vector<64x256xf32>
    %17 = arith.addf %0, %16 : vector<64x256xf32>
    %c0_11 = arith.constant 0 : index
    %c0_12 = arith.constant 0 : index
    %18 = vector.load %arg5[%c0_11, %c0_12] : memref<64x256xf32, #tpu.memory_space<vmem>>, vector<64x256xf32>
    tpu.vector_store %arg5[%c0_11, %c0_12], %17 {strides = array<i32>} : memref<64x256xf32, #tpu.memory_space<vmem>>, vector<64x256xf32>,
    return
  }
  func.func @transform_0(%arg0: i32) -> (i32, i32) {
    %c0_i32 = arith.constant 0 : i32
    %c0_i32_0 = arith.constant 0 : i32
    return %arg0, %c0_i32 : i32, i32
  }
  func.func @transform_1(%arg0: i32) -> (i32, i32) {
    %c0_i32 = arith.constant 0 : i32
    %c0_i32_0 = arith.constant 0 : i32
    %c0_i32_1 = arith.constant 0 : i32
    return %c0_i32, %c0_i32_0 : i32, i32
  }
  func.func @transform_2(%arg0: i32) -> (i32, i32) {
    %c0_i32 = arith.constant 0 : i32
    %c0_i32_0 = arith.constant 0 : i32
    %c0_i32_1 = arith.constant 0 : i32
    return %c0_i32, %c0_i32_0 : i32, i32
  }
  func.func @transform_3(%arg0: i32) -> (i32, i32) {
    %c0_i32 = arith.constant 0 : i32
    %c0_i32_0 = arith.constant 0 : i32
    %c0_i32_1 = arith.constant 0 : i32
    return %c0_i32, %c0_i32_0 : i32, i32
  }
  func.func @transform_4(%arg0: i32) -> (i32, i32) {
    %c0_i32 = arith.constant 0 : i32
    %c0_i32_0 = arith.constant 0 : i32
    return %arg0, %c0_i32 : i32, i32
  }
}

module attributes {stable_mosaic.version = 11 : i64} {
  func.func @_linear_block_kernel(%arg0: i32, %arg1: memref<64x256xf32, #tpu.memory_space<vmem>>, %arg2: memref<256x256xbf16, #tpu.memory_space<vmem>>, %arg3: memref<256x256xbf16, #tpu.memory_space<vmem>>, %arg4: memref<2x256xf32, #tpu.memory_space<vmem>>, %arg5: memref<64x256xf32, #tpu.memory_space<vmem>>) attributes {dimension_semantics = [#tpu.dimension_semantics<parallel>], iteration_bounds = array<i64: 1>, scalar_prefetch = 0 : i64, scratch_operands = 0 : i64, tpu.core_type = #tpu.core_type<tc>, window_params = [{transform_indices = @transform_0, window_bounds = array<i64: 64, 256>}, {pipeline_mode = #tpu.pipeline_mode<synchronous>, transform_indices = @transform_1, window_bounds = array<i64: 256, 256>}, {pipeline_mode = #tpu.pipeline_mode<synchronous>, transform_indices = @transform_2, window_bounds = array<i64: 256, 256>}, {pipeline_mode = #tpu.pipeline_mode<synchronous>, transform_indices = @transform_3, window_bounds = array<i64: 2, 256>}, {transform_indices = @transform_4, window_bounds = array<i64: 64, 256>}]} {
    %c0 = arith.constant 0 : index
    %c0_0 = arith.constant 0 : index
    %0 = vector.load %arg1[%c0, %c0_0] : memref<64x256xf32, #tpu.memory_space<vmem>>, vector<64x256xf32>
    %1 = arith.truncf %0 : vector<64x256xf32> to vector<64x256xbf16>
    %c0_1 = arith.constant 0 : index
    %c0_2 = arith.constant 0 : index
    %2 = vector.load %arg2[%c0_1, %c0_2] : memref<256x256xbf16, #tpu.memory_space<vmem>>, vector<256x256xbf16>
    %cst = arith.constant dense<0.000000e+00> : vector<64x256xf32>
    %3 = tpu.matmul %1, %2, %cst {dimension_numbers = #tpu.dot_dimension_numbers<[1], [0], [0], [1], [0, 0, 1, 1], [], []>} : vector<64x256xbf16>, vector<256x256xbf16>, vector<64x256xf32> -> vector<64x256xf32>
    %c0_3 = arith.constant 0 : index
    %c0_4 = arith.constant 0 : index
    %4 = vector.load %arg4[%c0_3, %c0_4] : memref<2x256xf32, #tpu.memory_space<vmem>>, vector<1x256xf32>
    %5 = vector.broadcast %4 : vector<1x256xf32> to vector<64x256xf32>
    %6 = arith.addf %3, %5 : vector<64x256xf32>
    %cst_5 = arith.constant 0.000000e+00 : f32
    %7 = vector.broadcast %cst_5 : f32 to vector<64x256xf32>
    %8 = arith.maximumf %6, %7 : vector<64x256xf32>
    %9 = arith.truncf %8 : vector<64x256xf32> to vector<64x256xbf16>
    %c0_6 = arith.constant 0 : index
    %c0_7 = arith.constant 0 : index
    %10 = vector.load %arg3[%c0_6, %c0_7] : memref<256x256xbf16, #tpu.memory_space<vmem>>, vector<256x256xbf16>
    %cst_8 = arith.constant dense<0.000000e+00> : vector<64x256xf32>
    %11 = tpu.matmul %9, %10, %cst_8 {dimension_numbers = #tpu.dot_dimension_numbers<[1], [0], [0], [1], [0, 0, 1, 1], [], []>} : vector<64x256xbf16>, vector<256x256xbf16>, vector<64x256xf32> -> vector<64x256xf32>
    %c1 = arith.constant 1 : index
    %c0_9 = arith.constant 0 : index
    %12 = vector.load %arg4[%c1, %c0_9] : memref<2x256xf32, #tpu.memory_space<vmem>>, vector<1x256xf32>
    %13 = vector.broadcast %12 : vector<1x256xf32> to vector<64x256xf32>
    %14 = arith.addf %11, %13 : vector<64x256xf32>
    %cst_10 = arith.constant 0.000000e+00 : f32
    %15 = vector.broadcast %cst_10 : f32 to vector<64x256xf32>
    %16 = arith.maximumf %14, %15 : vector<64x256xf32>
    %17 = arith.addf %0, %16 : vector<64x256xf32>
    %c0_11 = arith.constant 0 : index
    %c0_12 = arith.constant 0 : index
    %18 = vector.load %arg5[%c0_11, %c0_12] : memref<64x256xf32, #tpu.memory_space<vmem>>, vector<64x256xf32>
    tpu.vector_store %arg5[%c0_11, %c0_12], %17 {strides = array<i32>} : memref<64x256xf32, #tpu.memory_space<vmem>>, vector<64x256xf32>,
    return
  }
  func.func @transform_0(%arg0: i32) -> (i32, i32) {
    %c0_i32 = arith.constant 0 : i32
    %c0_i32_0 = arith.constant 0 : i32
    return %arg0, %c0_i32 : i32, i32
  }
  func.func @transform_1(%arg0: i32) -> (i32, i32) {
    %c0_i32 = arith.constant 0 : i32
    %c0_i32_0 = arith.constant 0 : i32
    %c0_i32_1 = arith.constant 0 : i32
    return %c0_i32, %c0_i32_0 : i32, i32
  }
  func.func @transform_2(%arg0: i32) -> (i32, i32) {
    %c0_i32 = arith.constant 0 : i32
    %c0_i32_0 = arith.constant 0 : i32
    %c0_i32_1 = arith.constant 0 : i32
    return %c0_i32, %c0_i32_0 : i32, i32
  }
  func.func @transform_3(%arg0: i32) -> (i32, i32) {
    %c0_i32 = arith.constant 0 : i32
    %c0_i32_0 = arith.constant 0 : i32
    %c0_i32_1 = arith.constant 0 : i32
    return %c0_i32, %c0_i32_0 : i32, i32
  }
  func.func @transform_4(%arg0: i32) -> (i32, i32) {
    %c0_i32 = arith.constant 0 : i32
    %c0_i32_0 = arith.constant 0 : i32
    return %arg0, %c0_i32 : i32, i32
  }
}

</mosaic_0001>

<bundles_post_ra>
// kernel: tpu_custom_call.1
= control target key start
LH: loop header
LB: loop body
LE: loop exit
PB: predicated region body
PF: predicated region fallthrough
CT: control target
= control target key end

     0   :  { %9 = vsyncpa [#allocation3], 0  ;;  %s1136_s0 = inlined_call_operand.hbm [shape: f32[64,256], index: 0, kind: input, shape index: {}]   ;;  %s1137_s1 = inlined_call_operand.hbm [shape: bf16[256,256], index: 1, kind: input, shape index: {}]   ;;  %s1138_s2 = inlined_call_operand.hbm [shape: bf16[256,256], index: 2, kind: input, shape index: {}]   ;;  %s1139_s3 = inlined_call_operand.vmem [shape: f32[2,256], index: 3, kind: input, shape index: {}]   ;;  %s1140_s4 = inlined_call_operand.hbm [shape: f32[64,256], index: 4, kind: output, shape index: {}]  }
   0x1   :  { %10 = vsyncpa [#allocation6], 0 }
   0x2   :  { %11 = vsyncpa [#allocation4], 0  ;;  %s983_s15 = smov [#allocation5]  }
   0x3   :  { %s29_s16 = sshll.u32 %s983_s15, 4  ;;  %s30_s16 = int_to_ptr.vmem [resolvable:$true] %s29_s16 }
   0x4   :  { %s905_s17 = scalar_lea.vmem %s30_s16, 4096  ;;  %p910_p1 = scmp.lt.s32.totalorder %s30_s16, %s30_s16 }
   0x5   :  { %p906_p0 = scmp.ne.s32.totalorder %s30_s16, %s905_s17  ;;  %p911_p2 = scmp.lt.s32.totalorder %s905_s17, %s905_s17 }
   0x7   :  { %p912_p3 = por %p911_p2, %p910_p1 }
   0x9   :  { %p913_p4 = pnand %p912_p3, %p906_p0 }
   0xb   :  { %916 = shalt.err (!%p913_p4)
}
   0xc   :  { %s984_s18 = smov 128   ;;  %s985_s19 = smov 8  }
   0xd   :  { %35 = dma.hbm_to_vmem [thread:$0]  %s1137_s1, 4096, %s30_s16, [#allocation6], %s984_s18, %s984_s18, %s985_s19  }
   0xe   :  { %s986_s22 = smov [#allocation2]  }
   0xf   :  { %s17_s23 = sshll.u32 %s986_s22, 4  ;;  %s18_s23 = int_to_ptr.vmem [resolvable:$true] %s17_s23 }
  0x10   :  { %s925_s24 = scalar_lea.vmem %s18_s23, 2048  ;;  %p930_p6 = scmp.lt.s32.totalorder %s18_s23, %s18_s23 }
  0x11   :  { %p926_p5 = scmp.ne.s32.totalorder %s18_s23, %s925_s24  ;;  %p931_p7 = scmp.lt.s32.totalorder %s925_s24, %s925_s24 }
  0x13   :  { %p932_p8 = por %p931_p7, %p930_p6 }
  0x15   :  { %p933_p9 = pnand %p932_p8, %p926_p5 }
  0x17   :  { %936 = shalt.err (!%p933_p9)
}
  0x18   :  { %s987_s25 = smov 256   ;;  %s988_s26 = smov 16  }
  0x19   :  { %23 = dma.hbm_to_vmem [thread:$0]  %s1136_s0, 2048, %s18_s23, [#allocation3], %s987_s25, %s987_s25, %s988_s26  }
  0x1a   :  { %s989_s1 = smov [#allocation7]  }
  0x1b   :  { %s41_s29 = sshll.u32 %s989_s1, 4  ;;  %s42_s29 = int_to_ptr.vmem [resolvable:$true] %s41_s29 }
  0x1c   :  { %s945_s30 = scalar_lea.vmem %s42_s29, 4096  ;;  %p950_p11 = scmp.lt.s32.totalorder %s42_s29, %s42_s29 }
  0x1d   :  { %p946_p10 = scmp.ne.s32.totalorder %s42_s29, %s945_s30  ;;  %p951_p12 = scmp.lt.s32.totalorder %s945_s30, %s945_s30 }
  0x1f   :  { %p952_p13 = por %p951_p12, %p950_p11 }
  0x21   :  { %p953_p0 = pnand %p952_p13, %p946_p10 }
  0x23   :  { %956 = shalt.err (!%p953_p0)
}
  0x24   :  { %47 = dma.hbm_to_vmem [thread:$0]  %s1138_s2, 4096, %s42_s29, [#allocation6], %s984_s18, %s984_s18, %s985_s19  }
  0x25   :  { %977 = dma.done.wait [#allocation3], 2048  }
  0x26   :  { %978 = vsyncadd [#allocation3], 4294965248 }
  0x27   :  { %979 = dma.done.wait [#allocation6], 8192  }
  0x28   :  { %980 = vsyncadd [#allocation6], 4294959104  ;;  %v801_v0 = vld [vmem:[#allocation5 + $0x74] ss:$8 sps:$4 sm:$0xff]   ;;  %v803_v1 = vld [vmem:[#allocation5 + $0x70] ss:$8 sps:$4 sm:$0xff]  }
  0x29   :  { %287 = vmatprep.subr.bf16.mxu0 %v801_v0  ;;  %v804_v2 = vld [vmem:[#allocation5 + $0x64] ss:$8 sps:$4 sm:$0xff]   ;;  %v806_v3 = vld [vmem:[#allocation5 + $0x60] ss:$8 sps:$4 sm:$0xff]   ;;  %v807_v4 = vld [vmem:[#allocation5 + $0x54] ss:$8 sps:$4 sm:$0xff]  }
  0x2a   :  { %288 = vmatpush1.bf16.msra.mxu0 %v803_v1  ;;  %v809_v5 = vld [vmem:[#allocation5 + $0x50] ss:$8 sps:$4 sm:$0xff]   ;;  %v810_v6 = vld [vmem:[#allocation5 + $0x44] ss:$8 sps:$4 sm:$0xff]   ;;  %v812_v7 = vld [vmem:[#allocation5 + $0x40] ss:$8 sps:$4 sm:$0xff]  }
  0x2b   :  { %289 = vmatprep.subr.bf16.mxu0 %v804_v2  ;;  %v813_v8 = vld [vmem:[#allocation5 + $0x34] ss:$8 sps:$4 sm:$0xff]   ;;  %v815_v9 = vld [vmem:[#allocation5 + $0x30] ss:$8 sps:$4 sm:$0xff]   ;;  %v816_v10 = vld [vmem:[#allocation5 + $0x24] ss:$8 sps:$4 sm:$0xff]  }
  0x2c   :  { %v818_v11 = vld [vmem:[#allocation5 + $0x20] ss:$8 sps:$4 sm:$0xff]   ;;  %v819_v12 = vld [vmem:[#allocation5 + $0x14] ss:$8 sps:$4 sm:$0xff]   ;;  %v821_v16 = vld [vmem:[#allocation5 + $0x10] ss:$8 sps:$4 sm:$0xff]  }
  0x2d   :  { %v1028_v13 = vld [vmem:[#allocation2 + $0x8] sm:$0xff]  ;;  %v1030_v14 = vld [vmem:[#allocation2 + $0x18] sm:$0xff]  ;;  %v1034_v53 = vld [vmem:[#allocation2] sm:$0xff] }
  0x2e   :  { %290 = vmatpush1.bf16.msra.mxu0 %v806_v3  ;;  %v76_v15 = vpack.c.bf16 %v1030_v14, %v1028_v13  ;;  %v822_v17 = vld [vmem:[#allocation5 + $0x4] ss:$8 sps:$4 sm:$0xff]   ;;  %v824_v18 = vld [vmem:[#allocation5] ss:$8 sps:$4 sm:$0xff]   ;;  %v825_v19 = vld [vmem:[#allocation5 + $0xf4] ss:$8 sps:$4 sm:$0xff]  }
  0x2f   :  { %291 = vmatprep.subr.bf16.mxu0 %v807_v4  ;;  %v849_v20 = vld [vmem:[#allocation7 + $0x74] ss:$8 sps:$4 sm:$0xff]   ;;  %v851_v21 = vld [vmem:[#allocation7 + $0x70] ss:$8 sps:$4 sm:$0xff]   ;;  %v852_v22 = vld [vmem:[#allocation7 + $0x64] ss:$8 sps:$4 sm:$0xff]  }
  0x30   :  { %319 = vmatprep.mubr.bf16.mxu0 %v76_v15  ;;  %589 = vmatprep.subr.bf16.mxu1 %v849_v20  ;;  %v854_v23 = vld [vmem:[#allocation7 + $0x60] ss:$8 sps:$4 sm:$0xff]   ;;  %v827_v24 = vld [vmem:[#allocation5 + $0xf0] ss:$8 sps:$4 sm:$0xff]   ;;  %v855_v25 = vld [vmem:[#allocation7 + $0x54] ss:$8 sps:$4 sm:$0xff]  }
  0x31   :  { %590 = vmatpush1.bf16.msra.mxu1 %v851_v21  ;;  %v828_v26 = vld [vmem:[#allocation5 + $0xe4] ss:$8 sps:$4 sm:$0xff]   ;;  %v857_v27 = vld [vmem:[#allocation7 + $0x50] ss:$8 sps:$4 sm:$0xff]   ;;  %v830_v28 = vld [vmem:[#allocation5 + $0xe0] ss:$8 sps:$4 sm:$0xff]  }
  0x32   :  { %292 = vmatpush1.bf16.msra.mxu0 %v809_v5  ;;  %591 = vmatprep.subr.bf16.mxu1 %v852_v22  ;;  %v858_v29 = vld [vmem:[#allocation7 + $0x44] ss:$8 sps:$4 sm:$0xff]   ;;  %v831_v30 = vld [vmem:[#allocation5 + $0xd4] ss:$8 sps:$4 sm:$0xff]   ;;  %v860_v31 = vld [vmem:[#allocation7 + $0x40] ss:$8 sps:$4 sm:$0xff]  }
  0x33   :  { %293 = vmatprep.subr.bf16.mxu0 %v810_v6  ;;  %v833_v32 = vld [vmem:[#allocation5 + $0xd0] ss:$8 sps:$4 sm:$0xff]   ;;  %v861_v33 = vld [vmem:[#allocation7 + $0x34] ss:$8 sps:$4 sm:$0xff]   ;;  %v834_v34 = vld [vmem:[#allocation5 + $0xc4] ss:$8 sps:$4 sm:$0xff]  }
  0x34   :  { %v863_v35 = vld [vmem:[#allocation7 + $0x30] ss:$8 sps:$4 sm:$0xff]   ;;  %v836_v36 = vld [vmem:[#allocation5 + $0xc0] ss:$8 sps:$4 sm:$0xff]   ;;  %v864_v37 = vld [vmem:[#allocation7 + $0x24] ss:$8 sps:$4 sm:$0xff]  }
  0x35   :  { %592 = vmatpush1.bf16.msra.mxu1 %v854_v23  ;;  %v837_v38 = vld [vmem:[#allocation5 + $0xb4] ss:$8 sps:$4 sm:$0xff]   ;;  %v866_v39 = vld [vmem:[#allocation7 + $0x20] ss:$8 sps:$4 sm:$0xff]   ;;  %v839_v40 = vld [vmem:[#allocation5 + $0xb0] ss:$8 sps:$4 sm:$0xff]  }
  0x36   :  { %294 = vmatpush1.bf16.msra.mxu0 %v812_v7  ;;  %593 = vmatprep.subr.bf16.mxu1 %v855_v25  ;;  %v867_v41 = vld [vmem:[#allocation7 + $0x14] ss:$8 sps:$4 sm:$0xff]   ;;  %v840_v42 = vld [vmem:[#allocation5 + $0xa4] ss:$8 sps:$4 sm:$0xff]   ;;  %v869_v43 = vld [vmem:[#allocation7 + $0x10] ss:$8 sps:$4 sm:$0xff]  }
  0x37   :  { %295 = vmatprep.subr.bf16.mxu0 %v813_v8  ;;  %v842_v44 = vld [vmem:[#allocation5 + $0xa0] ss:$8 sps:$4 sm:$0xff]   ;;  %v870_v45 = vld [vmem:[#allocation7 + $0x4] ss:$8 sps:$4 sm:$0xff]   ;;  %v843_v46 = vld [vmem:[#allocation5 + $0x94] ss:$8 sps:$4 sm:$0xff]  }
  0x38   :  { %v872_v47 = vld [vmem:[#allocation7] ss:$8 sps:$4 sm:$0xff]   ;;  %v845_v48 = vld [vmem:[#allocation5 + $0x90] ss:$8 sps:$4 sm:$0xff]   ;;  %v873_v49 = vld [vmem:[#allocation7 + $0xf4] ss:$8 sps:$4 sm:$0xff]  }
  0x39   :  { %594 = vmatpush1.bf16.msra.mxu1 %v857_v27  ;;  %v846_v50 = vld [vmem:[#allocation5 + $0x84] ss:$8 sps:$4 sm:$0xff]   ;;  %v848_v51 = vld [vmem:[#allocation5 + $0x80] ss:$8 sps:$4 sm:$0xff]   ;;  %v875_v52 = vld [vmem:[#allocation7 + $0xf0] ss:$8 sps:$4 sm:$0xff]  }
  0x3a   :  { %296 = vmatpush1.bf16.msra.mxu0 %v815_v9  ;;  %595 = vmatprep.subr.bf16.mxu1 %v858_v29  ;;  %v1036_v54 = vld [vmem:[#allocation2 + $0x10] sm:$0xff]  ;;  %v876_v55 = vld [vmem:[#allocation7 + $0xe4] ss:$8 sps:$4 sm:$0xff]   ;;  %v1040_v57 = vld [vmem:[#allocation2 + $0x38] sm:$0xff] }
  0x3b   :  { %297 = vmatprep.subr.bf16.mxu0 %v816_v10  ;;  %v1038_v56 = vld [vmem:[#allocation2 + $0x28] sm:$0xff]  ;;  %v75_v58 = vpack.c.bf16 %v1036_v54, %v1034_v53  ;;  %v879_v61 = vld [vmem:[#allocation7 + $0xd4] ss:$8 sps:$4 sm:$0xff]   ;;  %v881_v62 = vld [vmem:[#allocation7 + $0xd0] ss:$8 sps:$4 sm:$0xff]  }
  0x3c   :  { %v878_v59 = vld [vmem:[#allocation7 + $0xe0] ss:$8 sps:$4 sm:$0xff]   ;;  %v78_v60 = vpack.c.bf16 %v1040_v57, %v1038_v56  ;;  %v1048_v0 = vld [vmem:[#allocation2 + $0x30] sm:$0xff]  ;;  %v882_v1 = vld [vmem:[#allocation7 + $0xc4] ss:$8 sps:$4 sm:$0xff]  }
  0x3d   :  { %596 = vmatpush1.bf16.msra.mxu1 %v860_v31  ;;  %v1046_v63 = vld [vmem:[#allocation2 + $0x20] sm:$0xff]  ;;  %v1050_v2 = vld [vmem:[#allocation2 + $0x48] sm:$0xff]  ;;  %v1052_v3 = vld [vmem:[#allocation2 + $0x58] sm:$0xff] }
  0x3e   :  { %298 = vmatpush1.bf16.msra.mxu0 %v818_v11  ;;  %597 = vmatprep.subr.bf16.mxu1 %v861_v33  ;;  %v77_v4 = vpack.c.bf16 %v1048_v0, %v1046_v63  ;;  %v884_v5 = vld [vmem:[#allocation7 + $0xc0] ss:$8 sps:$4 sm:$0xff]   ;;  %v80_v6 = vpack.c.bf16 %v1052_v3, %v1050_v2  ;;  %v885_v7 = vld [vmem:[#allocation7 + $0xb4] ss:$8 sps:$4 sm:$0xff]   ;;  %v887_v8 = vld [vmem:[#allocation7 + $0xb0] ss:$8 sps:$4 sm:$0xff]  }
  0x3f   :  { %299 = vmatprep.subr.bf16.mxu0 %v819_v12  ;;  %v1058_v9 = vld [vmem:[#allocation2 + $0x40] sm:$0xff]  ;;  %v1060_v10 = vld [vmem:[#allocation2 + $0x50] sm:$0xff]  ;;  %v1062_v11 = vld [vmem:[#allocation2 + $0x68] sm:$0xff] }
  0x40   :  { %v1064_v12 = vld [vmem:[#allocation2 + $0x78] sm:$0xff]  ;;  %v79_v15 = vpack.c.bf16 %v1060_v10, %v1058_v9  ;;  %v888_v20 = vld [vmem:[#allocation7 + $0xa4] ss:$8 sps:$4 sm:$0xff]   ;;  %v890_v21 = vld [vmem:[#allocation7 + $0xa0] ss:$8 sps:$4 sm:$0xff]  }
  0x41   :  { %598 = vmatpush1.bf16.msra.mxu1 %v863_v35  ;;  %v891_v22 = vld [vmem:[#allocation7 + $0x94] ss:$8 sps:$4 sm:$0xff]   ;;  %v893_v23 = vld [vmem:[#allocation7 + $0x90] ss:$8 sps:$4 sm:$0xff]   ;;  %v896_v25 = vld [vmem:[#allocation7 + $0x80] ss:$8 sps:$4 sm:$0xff]  }
  0x42   :  { %300 = vmatpush1.bf16.msra.mxu0 %v821_v16  ;;  %599 = vmatprep.subr.bf16.mxu1 %v864_v37  ;;  %v82_v16 = vpack.c.bf16 %v1064_v12, %v1062_v11 }
  0x43   :  { %301 = vmatprep.subr.bf16.mxu0 %v822_v17  ;;  %v1070_v17 = vld [vmem:[#allocation2 + $0x60] sm:$0xff] }
  0x45   :  { %600 = vmatpush1.bf16.msra.mxu1 %v866_v39 }
  0x46   :  { %302 = vmatpush1.bf16.msra.mxu0 %v824_v18  ;;  %601 = vmatprep.subr.bf16.mxu1 %v867_v41  ;;  %v1072_v18 = vld [vmem:[#allocation2 + $0x70] sm:$0xff] }
  0x47   :  { %303 = vmatprep.subr.bf16.mxu0 %v825_v19  ;;  %v81_v19 = vpack.c.bf16 %v1072_v18, %v1070_v17 }
  0x49   :  { %602 = vmatpush1.bf16.msra.mxu1 %v869_v43 }
  0x4a   :  { %304 = vmatpush2.bf16.msra.mxu0 %v827_v24  ;;  %603 = vmatprep.subr.bf16.mxu1 %v870_v45  ;;  %v894_v24 = vld [vmem:[#allocation7 + $0x84] ss:$8 sps:$4 sm:$0xff]  }
  0x4b   :  { %305 = vmatprep.subr.bf16.mxu0 %v828_v26  ;;  %v117_v26 = vlaneseq }
  0x4d   :  { %604 = vmatpush1.bf16.msra.mxu1 %v872_v47  ;;  %v1076_v27 = vshrl.u32 %v117_v26, 7 }
  0x4e   :  { %306 = vmatpush2.bf16.msra.mxu0 %v830_v28  ;;  %605 = vmatprep.subr.bf16.mxu1 %v873_v49 }
  0x4f   :  { %307 = vmatprep.subr.bf16.mxu0 %v831_v30  ;;  %v123_v28 = vsub.s32 1, %v1076_v27  ;;  %v119_v29 = vsub.s32 0, %v1076_v27  ;;  %v115_v30 = vld [vmem:[%s1139_s3] ss:$2 sm:$0x3] }
  0x51   :  { %606 = vmatpush2.bf16.msra.mxu1 %v875_v52  ;;  %v120_v33 = vrot.slane %v115_v30, %v119_v29 }
  0x52   :  { %308 = vmatpush2.bf16.msra.mxu0 %v833_v32  ;;  %607 = vmatprep.subr.bf16.mxu1 %v876_v55  ;;  %v124_v32 = vrot.slane %v115_v30, %v123_v28 }
  0x53   :  { %309 = vmatprep.subr.bf16.mxu0 %v834_v34 }
  0x55   :  { %608 = vmatpush2.bf16.msra.mxu1 %v878_v59 }
  0x56   :  { %310 = vmatpush2.bf16.msra.mxu0 %v836_v36  ;;  %609 = vmatprep.subr.bf16.mxu1 %v879_v61 }
  0x57   :  { %311 = vmatprep.subr.bf16.mxu0 %v837_v38 }
  0x59   :  { %610 = vmatpush2.bf16.msra.mxu1 %v881_v62 }
  0x5a   :  { %312 = vmatpush2.bf16.msra.mxu0 %v839_v40  ;;  %611 = vmatprep.subr.bf16.mxu1 %v882_v1 }
  0x5b   :  { %313 = vmatprep.subr.bf16.mxu0 %v840_v42 }
  0x5d   :  { %612 = vmatpush2.bf16.msra.mxu1 %v884_v5 }
  0x5e   :  { %314 = vmatpush2.bf16.msra.mxu0 %v842_v44  ;;  %613 = vmatprep.subr.bf16.mxu1 %v885_v7 }
  0x5f   :  { %315 = vmatprep.subr.bf16.mxu0 %v843_v46 }
  0x61   :  { %614 = vmatpush2.bf16.msra.mxu1 %v887_v8 }
  0x62   :  { %316 = vmatpush2.bf16.msra.mxu0 %v845_v48  ;;  %615 = vmatprep.subr.bf16.mxu1 %v888_v20 }
  0x63   :  { %317 = vmatprep.subr.bf16.mxu0 %v846_v50 }
  0x65   :  { %616 = vmatpush2.bf16.msra.mxu1 %v890_v21 }
  0x66   :  { %318 = vmatpush2.bf16.msra.mxu0 %v848_v51  ;;  %617 = vmatprep.subr.bf16.mxu1 %v891_v22 }
  0x69   :  { %320 = vmatmul.mubr.bf16.vlgmr.msra.gmra.mxu0 %v75_v58  ;;  %618 = vmatpush2.bf16.msra.mxu1 %v893_v23 }
  0x6a   :  { %329 = vmatprep.mubr.bf16.mxu0 %v78_v60  ;;  %619 = vmatprep.subr.bf16.mxu1 %v894_v24 }
  0x6d   :  { %620 = vmatpush2.bf16.msra.mxu1 %v896_v25 }
  0x71   :  { %330 = vmatmul.mubr.bf16.gmra.mxu0 %v77_v4 }
  0x72   :  { %339 = vmatprep.mubr.bf16.mxu0 %v80_v6 }
  0x79   :  { %340 = vmatmul.mubr.bf16.gmra.mxu0 %v79_v15 }
  0x7a   :  { %349 = vmatprep.mubr.bf16.mxu0 %v82_v16 }
  0x81   :  { %350 = vmatmul.mubr.bf16.gmra.mxu0 %v81_v19 }
 0x129   :  { %v321_v31 = vpop.f32.mrf.mxu0 }
 0x12a   :  { %v322_v38 = vadd.f32 %v321_v31, %v120_v33 }
 0x12b   :  { %v323_v34 = vpop.f32.mrf.mxu0 }
 0x12c   :  { %v324_v36 = vadd.f32 %v323_v34, %v124_v32  ;;  %v360_v45 = vmax.f32 %v322_v38, 0.0 }
 0x12d   :  { %v325_v35 = vpop.f32.mrf.mxu0 }
 0x12e   :  { %v326_v37 = vadd.f32 %v325_v35, %v120_v33  ;;  %v361_v43 = vmax.f32 %v324_v36, 0.0 }
 0x12f   :  { %v327_v39 = vpop.f32.mrf.mxu0 }
 0x130   :  { %v328_v40 = vadd.f32 %v327_v39, %v124_v32  ;;  %v362_v41 = vmax.f32 %v326_v37, 0.0 }
 0x131   :  { %v331_v42 = vpop.f32.mrf.mxu0 }
 0x132   :  { %v363_v44 = vmax.f32 %v328_v40, 0.0  ;;  %v376_v48 = vpack.c.bf16 %v362_v41, %v360_v45  ;;  %v332_v52 = vadd.f32 %v331_v42, %v120_v33 }
 0x133   :  { %v333_v46 = vpop.f32.mrf.mxu0 }
 0x134   :  { %v377_v47 = vpack.c.bf16 %v363_v44, %v361_v43  ;;  %v334_v50 = vadd.f32 %v333_v46, %v124_v32  ;;  %v364_v1 = vmax.f32 %v332_v52, 0.0  ;;  %v760_v46 = vld [vmem:[%s1139_s3 + $0x1] ss:$2 sm:$0x3]  ;;  %s990_s3 = smov [#allocation8]  }
 0x135   :  { %v335_v49 = vpop.f32.mrf.mxu0  ;;  %s715_s9 = sshll.u32 %s990_s3, 4  ;;  %s716_s9 = int_to_ptr.vmem [resolvable:$true] %s715_s9 }
 0x136   :  { %v336_v51 = vadd.f32 %v335_v49, %v120_v33  ;;  %621 = vmatprep.mubr.bf16.mxu1 %v377_v47  ;;  %v365_v61 = vmax.f32 %v334_v50, 0.0  ;;  %v1092_v47 = vrot.slane %v760_v46, %v119_v29  ;;  %s957_s10 = scalar_lea.vmem %s716_s9, 2048  ;;  %p962_p2 = scmp.lt.s32.totalorder %s716_s9, %s716_s9 }
 0x137   :  { %v337_v55 = vpop.f32.mrf.mxu0  ;;  %622 = vmatmul.mubr.bf16.vlgmr.msra.gmra.mxu1 %v376_v48  ;;  %p958_p1 = scmp.ne.s32.totalorder %s716_s9, %s957_s10  ;;  %p963_p3 = scmp.lt.s32.totalorder %s957_s10, %s957_s10 }
 0x138   :  { %v338_v58 = vadd.f32 %v337_v55, %v124_v32  ;;  %v366_v59 = vmax.f32 %v336_v51, 0.0 }
 0x139   :  { %v341_v60 = vpop.f32.mrf.mxu0  ;;  %p964_p4 = por %p963_p3, %p962_p2 }
 0x13a   :  { %v367_v62 = vmax.f32 %v338_v58, 0.0  ;;  %v378_v6 = vpack.c.bf16 %v366_v59, %v364_v1  ;;  %v342_v16 = vadd.f32 %v341_v60, %v120_v33 }
 0x13b   :  { %v343_v4 = vpop.f32.mrf.mxu0  ;;  %p965_p5 = pnand %p964_p4, %p958_p1 }
 0x13c   :  { %v379_v5 = vpack.c.bf16 %v367_v62, %v365_v61  ;;  %v344_v8 = vadd.f32 %v343_v4, %v124_v32  ;;  %v368_v25 = vmax.f32 %v342_v16, 0.0 }
 0x13d   :  { %v345_v7 = vpop.f32.mrf.mxu0 }
 0x13e   :  { %v346_v15 = vadd.f32 %v345_v7, %v120_v33  ;;  %631 = vmatprep.mubr.bf16.mxu1 %v379_v5  ;;  %v369_v23 = vmax.f32 %v344_v8, 0.0 }
 0x13f   :  { %v347_v19 = vpop.f32.mrf.mxu0  ;;  %632 = vmatmul.mubr.bf16.gmra.mxu1 %v378_v6 }
 0x140   :  { %v348_v20 = vadd.f32 %v347_v19, %v124_v32  ;;  %v370_v21 = vmax.f32 %v346_v15, 0.0 }
 0x141   :  { %v351_v22 = vpop.f32.mrf.mxu0 }
 0x142   :  { %v371_v24 = vmax.f32 %v348_v20, 0.0  ;;  %v380_v31 = vpack.c.bf16 %v370_v21, %v368_v25  ;;  %v352_v37 = vadd.f32 %v351_v22, %v120_v33 }
 0x143   :  { %v353_v26 = vpop.f32.mrf.mxu0 }
 0x144   :  { %v381_v30 = vpack.c.bf16 %v371_v24, %v369_v23  ;;  %v354_v35 = vadd.f32 %v353_v26, %v124_v32  ;;  %v372_v43 = vmax.f32 %v352_v37, 0.0 }
 0x145   :  { %v355_v34 = vpop.f32.mrf.mxu0 }
 0x146   :  { %v356_v36 = vadd.f32 %v355_v34, %v120_v33  ;;  %641 = vmatprep.mubr.bf16.mxu1 %v381_v30  ;;  %v373_v41 = vmax.f32 %v354_v35, 0.0  ;;  %v1096_v33 = vrot.slane %v760_v46, %v123_v28 }
 0x147   :  { %v357_v38 = vpop.f32.mrf.mxu0  ;;  %642 = vmatmul.mubr.bf16.gmra.mxu1 %v380_v31 }
 0x148   :  { %v358_v39 = vadd.f32 %v357_v38, %v124_v32  ;;  %v374_v40 = vmax.f32 %v356_v36, 0.0 }
 0x14a   :  { %v375_v42 = vmax.f32 %v358_v39, 0.0  ;;  %v382_v45 = vpack.c.bf16 %v374_v40, %v372_v43 }
 0x14c   :  { %v383_v44 = vpack.c.bf16 %v375_v42, %v373_v41 }
 0x14e   :  { %651 = vmatprep.mubr.bf16.mxu1 %v383_v44 }
 0x14f   :  { %652 = vmatmul.mubr.bf16.gmra.mxu1 %v382_v45 }
 0x1f7   :  { %v623_v32 = vpop.f32.mrf.mxu1 }
 0x1f8   :  { %v624_v48 = vadd.f32 %v623_v32, %v1092_v47 }
 0x1f9   :  { %v625_v49 = vpop.f32.mrf.mxu1 }
 0x1fa   :  { %v662_v50 = vmax.f32 %v624_v48, 0.0  ;;  %v626_v51 = vadd.f32 %v625_v49, %v1096_v33 }
 0x1fb   :  { %v627_v52 = vpop.f32.mrf.mxu1 }
 0x1fc   :  { %v678_v55 = vadd.f32 %v662_v50, %v1034_v53  ;;  %v663_v58 = vmax.f32 %v626_v51, 0.0  ;;  %v628_v59 = vadd.f32 %v627_v52, %v1092_v47 }
 0x1fd   :  { %v629_v60 = vpop.f32.mrf.mxu1 }
 0x1fe   :  { %694 = vst [vmem:[#allocation8] sm:$0xff] %v678_v55  ;;  %v679_v29 = vadd.f32 %v663_v58, %v1028_v13  ;;  %v664_v27 = vmax.f32 %v628_v59, 0.0  ;;  %v630_v28 = vadd.f32 %v629_v60, %v1096_v33 }
 0x1ff   :  { %v633_v61 = vpop.f32.mrf.mxu1 }
 0x200   :  { %695 = vst [vmem:[#allocation8 + $0x8] sm:$0xff] %v679_v29  ;;  %v680_v62 = vadd.f32 %v664_v27, %v1036_v54  ;;  %v665_v1 = vmax.f32 %v630_v28, 0.0  ;;  %v634_v4 = vadd.f32 %v633_v61, %v1092_v47 }
 0x201   :  { %v635_v5 = vpop.f32.mrf.mxu1 }
 0x202   :  { %696 = vst [vmem:[#allocation8 + $0x10] sm:$0xff] %v680_v62  ;;  %v681_v53 = vadd.f32 %v665_v1, %v1030_v14  ;;  %v666_v6 = vmax.f32 %v634_v4, 0.0  ;;  %v636_v7 = vadd.f32 %v635_v5, %v1096_v33 }
 0x203   :  { %v637_v8 = vpop.f32.mrf.mxu1 }
 0x204   :  { %697 = vst [vmem:[#allocation8 + $0x18] sm:$0xff] %v681_v53  ;;  %v682_v13 = vadd.f32 %v666_v6, %v1046_v63  ;;  %v667_v15 = vmax.f32 %v636_v7, 0.0  ;;  %v638_v16 = vadd.f32 %v637_v8, %v1092_v47 }
 0x205   :  { %v639_v19 = vpop.f32.mrf.mxu1 }
 0x206   :  { %698 = vst [vmem:[#allocation8 + $0x20] sm:$0xff] %v682_v13  ;;  %v683_v54 = vadd.f32 %v667_v15, %v1038_v56  ;;  %v668_v20 = vmax.f32 %v638_v16, 0.0  ;;  %v640_v21 = vadd.f32 %v639_v19, %v1096_v33 }
 0x207   :  { %v643_v22 = vpop.f32.mrf.mxu1 }
 0x208   :  { %699 = vst [vmem:[#allocation8 + $0x28] sm:$0xff] %v683_v54  ;;  %v684_v14 = vadd.f32 %v668_v20, %v1048_v0  ;;  %v669_v23 = vmax.f32 %v640_v21, 0.0  ;;  %v644_v24 = vadd.f32 %v643_v22, %v1092_v47 }
 0x209   :  { %v645_v25 = vpop.f32.mrf.mxu1 }
 0x20a   :  { %700 = vst [vmem:[#allocation8 + $0x30] sm:$0xff] %v684_v14  ;;  %v685_v63 = vadd.f32 %v669_v23, %v1040_v57  ;;  %v670_v26 = vmax.f32 %v644_v24, 0.0  ;;  %v646_v30 = vadd.f32 %v645_v25, %v1096_v33 }
 0x20b   :  { %v647_v31 = vpop.f32.mrf.mxu1 }
 0x20c   :  { %701 = vst [vmem:[#allocation8 + $0x38] sm:$0xff] %v685_v63  ;;  %v686_v56 = vadd.f32 %v670_v26, %v1058_v9  ;;  %v671_v34 = vmax.f32 %v646_v30, 0.0  ;;  %v648_v35 = vadd.f32 %v647_v31, %v1092_v47 }
 0x20d   :  { %v649_v36 = vpop.f32.mrf.mxu1 }
 0x20e   :  { %702 = vst [vmem:[#allocation8 + $0x40] sm:$0xff] %v686_v56  ;;  %v687_v0 = vadd.f32 %v671_v34, %v1050_v2  ;;  %v672_v37 = vmax.f32 %v648_v35, 0.0  ;;  %v650_v38 = vadd.f32 %v649_v36, %v1096_v33 }
 0x20f   :  { %v653_v39 = vpop.f32.mrf.mxu1 }
 0x210   :  { %703 = vst [vmem:[#allocation8 + $0x48] sm:$0xff] %v687_v0  ;;  %v688_v57 = vadd.f32 %v672_v37, %v1060_v10  ;;  %v673_v40 = vmax.f32 %v650_v38, 0.0  ;;  %v654_v41 = vadd.f32 %v653_v39, %v1092_v47 }
 0x211   :  { %v655_v42 = vpop.f32.mrf.mxu1 }
 0x212   :  { %704 = vst [vmem:[#allocation8 + $0x50] sm:$0xff] %v688_v57  ;;  %v689_v9 = vadd.f32 %v673_v40, %v1052_v3  ;;  %v674_v43 = vmax.f32 %v654_v41, 0.0  ;;  %v656_v44 = vadd.f32 %v655_v42, %v1096_v33 }
 0x213   :  { %v657_v45 = vpop.f32.mrf.mxu1 }
 0x214   :  { %705 = vst [vmem:[#allocation8 + $0x58] sm:$0xff] %v689_v9  ;;  %v690_v2 = vadd.f32 %v674_v43, %v1070_v17  ;;  %v675_v46 = vmax.f32 %v656_v44, 0.0  ;;  %v658_v32 = vadd.f32 %v657_v45, %v1092_v47 }
 0x215   :  { %v659_v48 = vpop.f32.mrf.mxu1 }
 0x216   :  { %706 = vst [vmem:[#allocation8 + $0x60] sm:$0xff] %v690_v2  ;;  %v691_v10 = vadd.f32 %v675_v46, %v1062_v11  ;;  %v676_v49 = vmax.f32 %v658_v32, 0.0  ;;  %v660_v50 = vadd.f32 %v659_v48, %v1096_v33 }
 0x218   :  { %707 = vst [vmem:[#allocation8 + $0x68] sm:$0xff] %v691_v10  ;;  %v692_v3 = vadd.f32 %v676_v49, %v1072_v18  ;;  %v677_v51 = vmax.f32 %v660_v50, 0.0 }
 0x21a   :  { %708 = vst [vmem:[#allocation8 + $0x70] sm:$0xff] %v692_v3  ;;  %v693_v52 = vadd.f32 %v677_v51, %v1064_v12 }
 0x21c   :  { %709 = vst [vmem:[#allocation8 + $0x78] sm:$0xff] %v693_v52 }
 0x21d   :  { %968 = shalt.err (!%p965_p5)
}
 0x21e   :  { %721 = dma.vmem_to_hbm [thread:$0]  %s716_s9, 2048, %s1140_s4, [#allocation4], %s987_s25, %s987_s25, %s988_s26  }
 0x21f   :  { %981 = dma.done.wait [#allocation4], 2048  }
 0x220   :  { %982 = vsyncadd [#allocation4], 4294965248 }
 0x221   :  { %725 = vsyncpa [#allocation3], 1 }
 0x222   :  { %726 = vsyncpa [#allocation6], 1 }
 0x223   :  { %727 = vsyncpa [#allocation4], 1 }

// kernel: tpu_custom_call.1
= control target key start
LH: loop header
LB: loop body
LE: loop exit
PB: predicated region body
PF: predicated region fallthrough
CT: control target
= control target key end

     0   :  { %9 = vsyncpa [#allocation3], 0  ;;  %s1136_s0 = inlined_call_operand.hbm [shape: f32[64,256], index: 0, kind: input, shape index: {}]   ;;  %s1137_s1 = inlined_call_operand.hbm [shape: bf16[256,256], index: 1, kind: input, shape index: {}]   ;;  %s1138_s2 = inlined_call_operand.hbm [shape: bf16[256,256], index: 2, kind: input, shape index: {}]   ;;  %s1139_s3 = inlined_call_operand.vmem [shape: f32[2,256], index: 3, kind: input, shape index: {}]   ;;  %s1140_s4 = inlined_call_operand.hbm [shape: f32[64,256], index: 4, kind: output, shape index: {}]  }
   0x1   :  { %10 = vsyncpa [#allocation6], 0 }
   0x2   :  { %11 = vsyncpa [#allocation4], 0  ;;  %s983_s15 = smov [#allocation5]  }
   0x3   :  { %s29_s16 = sshll.u32 %s983_s15, 4  ;;  %s30_s16 = int_to_ptr.vmem [resolvable:$true] %s29_s16 }
   0x4   :  { %s905_s17 = scalar_lea.vmem %s30_s16, 4096  ;;  %p910_p1 = scmp.lt.s32.totalorder %s30_s16, %s30_s16 }
   0x5   :  { %p906_p0 = scmp.ne.s32.totalorder %s30_s16, %s905_s17  ;;  %p911_p2 = scmp.lt.s32.totalorder %s905_s17, %s905_s17 }
   0x7   :  { %p912_p3 = por %p911_p2, %p910_p1 }
   0x9   :  { %p913_p4 = pnand %p912_p3, %p906_p0 }
   0xb   :  { %916 = shalt.err (!%p913_p4)
}
   0xc   :  { %s984_s18 = smov 128   ;;  %s985_s19 = smov 8  }
   0xd   :  { %35 = dma.hbm_to_vmem [thread:$0]  %s1137_s1, 4096, %s30_s16, [#allocation6], %s984_s18, %s984_s18, %s985_s19  }
   0xe   :  { %s986_s22 = smov [#allocation2]  }
   0xf   :  { %s17_s23 = sshll.u32 %s986_s22, 4  ;;  %s18_s23 = int_to_ptr.vmem [resolvable:$true] %s17_s23 }
  0x10   :  { %s925_s24 = scalar_lea.vmem %s18_s23, 2048  ;;  %p930_p6 = scmp.lt.s32.totalorder %s18_s23, %s18_s23 }
  0x11   :  { %p926_p5 = scmp.ne.s32.totalorder %s18_s23, %s925_s24  ;;  %p931_p7 = scmp.lt.s32.totalorder %s925_s24, %s925_s24 }
  0x13   :  { %p932_p8 = por %p931_p7, %p930_p6 }
  0x15   :  { %p933_p9 = pnand %p932_p8, %p926_p5 }
  0x17   :  { %936 = shalt.err (!%p933_p9)
}
  0x18   :  { %s987_s25 = smov 256   ;;  %s988_s26 = smov 16  }
  0x19   :  { %23 = dma.hbm_to_vmem [thread:$0]  %s1136_s0, 2048, %s18_s23, [#allocation3], %s987_s25, %s987_s25, %s988_s26  }
  0x1a   :  { %s989_s1 = smov [#allocation7]  }
  0x1b   :  { %s41_s29 = sshll.u32 %s989_s1, 4  ;;  %s42_s29 = int_to_ptr.vmem [resolvable:$true] %s41_s29 }
  0x1c   :  { %s945_s30 = scalar_lea.vmem %s42_s29, 4096  ;;  %p950_p11 = scmp.lt.s32.totalorder %s42_s29, %s42_s29 }
  0x1d   :  { %p946_p10 = scmp.ne.s32.totalorder %s42_s29, %s945_s30  ;;  %p951_p12 = scmp.lt.s32.totalorder %s945_s30, %s945_s30 }
  0x1f   :  { %p952_p13 = por %p951_p12, %p950_p11 }
  0x21   :  { %p953_p0 = pnand %p952_p13, %p946_p10 }
  0x23   :  { %956 = shalt.err (!%p953_p0)
}
  0x24   :  { %47 = dma.hbm_to_vmem [thread:$0]  %s1138_s2, 4096, %s42_s29, [#allocation6], %s984_s18, %s984_s18, %s985_s19  }
  0x25   :  { %977 = dma.done.wait [#allocation3], 2048  }
  0x26   :  { %978 = vsyncadd [#allocation3], 4294965248 }
  0x27   :  { %979 = dma.done.wait [#allocation6], 8192  }
  0x28   :  { %980 = vsyncadd [#allocation6], 4294959104  ;;  %v801_v0 = vld [vmem:[#allocation5 + $0x74] ss:$8 sps:$4 sm:$0xff]   ;;  %v803_v1 = vld [vmem:[#allocation5 + $0x70] ss:$8 sps:$4 sm:$0xff]  }
  0x29   :  { %287 = vmatprep.subr.bf16.mxu0 %v801_v0  ;;  %v804_v2 = vld [vmem:[#allocation5 + $0x64] ss:$8 sps:$4 sm:$0xff]   ;;  %v806_v3 = vld [vmem:[#allocation5 + $0x60] ss:$8 sps:$4 sm:$0xff]   ;;  %v807_v4 = vld [vmem:[#allocation5 + $0x54] ss:$8 sps:$4 sm:$0xff]  }
  0x2a   :  { %288 = vmatpush1.bf16.msra.mxu0 %v803_v1  ;;  %v809_v5 = vld [vmem:[#allocation5 + $0x50] ss:$8 sps:$4 sm:$0xff]   ;;  %v810_v6 = vld [vmem:[#allocation5 + $0x44] ss:$8 sps:$4 sm:$0xff]   ;;  %v812_v7 = vld [vmem:[#allocation5 + $0x40] ss:$8 sps:$4 sm:$0xff]  }
  0x2b   :  { %289 = vmatprep.subr.bf16.mxu0 %v804_v2  ;;  %v813_v8 = vld [vmem:[#allocation5 + $0x34] ss:$8 sps:$4 sm:$0xff]   ;;  %v815_v9 = vld [vmem:[#allocation5 + $0x30] ss:$8 sps:$4 sm:$0xff]   ;;  %v816_v10 = vld [vmem:[#allocation5 + $0x24] ss:$8 sps:$4 sm:$0xff]  }
  0x2c   :  { %v818_v11 = vld [vmem:[#allocation5 + $0x20] ss:$8 sps:$4 sm:$0xff]   ;;  %v819_v12 = vld [vmem:[#allocation5 + $0x14] ss:$8 sps:$4 sm:$0xff]   ;;  %v821_v16 = vld [vmem:[#allocation5 + $0x10] ss:$8 sps:$4 sm:$0xff]  }
  0x2d   :  { %v1028_v13 = vld [vmem:[#allocation2 + $0x8] sm:$0xff]  ;;  %v1030_v14 = vld [vmem:[#allocation2 + $0x18] sm:$0xff]  ;;  %v1034_v53 = vld [vmem:[#allocation2] sm:$0xff] }
  0x2e   :  { %290 = vmatpush1.bf16.msra.mxu0 %v806_v3  ;;  %v76_v15 = vpack.c.bf16 %v1030_v14, %v1028_v13  ;;  %v822_v17 = vld [vmem:[#allocation5 + $0x4] ss:$8 sps:$4 sm:$0xff]   ;;  %v824_v18 = vld [vmem:[#allocation5] ss:$8 sps:$4 sm:$0xff]   ;;  %v825_v19 = vld [vmem:[#allocation5 + $0xf4] ss:$8 sps:$4 sm:$0xff]  }
  0x2f   :  { %291 = vmatprep.subr.bf16.mxu0 %v807_v4  ;;  %v849_v20 = vld [vmem:[#allocation7 + $0x74] ss:$8 sps:$4 sm:$0xff]   ;;  %v851_v21 = vld [vmem:[#allocation7 + $0x70] ss:$8 sps:$4 sm:$0xff]   ;;  %v852_v22 = vld [vmem:[#allocation7 + $0x64] ss:$8 sps:$4 sm:$0xff]  }
  0x30   :  { %319 = vmatprep.mubr.bf16.mxu0 %v76_v15  ;;  %589 = vmatprep.subr.bf16.mxu1 %v849_v20  ;;  %v854_v23 = vld [vmem:[#allocation7 + $0x60] ss:$8 sps:$4 sm:$0xff]   ;;  %v827_v24 = vld [vmem:[#allocation5 + $0xf0] ss:$8 sps:$4 sm:$0xff]   ;;  %v855_v25 = vld [vmem:[#allocation7 + $0x54] ss:$8 sps:$4 sm:$0xff]  }
  0x31   :  { %590 = vmatpush1.bf16.msra.mxu1 %v851_v21  ;;  %v828_v26 = vld [vmem:[#allocation5 + $0xe4] ss:$8 sps:$4 sm:$0xff]   ;;  %v857_v27 = vld [vmem:[#allocation7 + $0x50] ss:$8 sps:$4 sm:$0xff]   ;;  %v830_v28 = vld [vmem:[#allocation5 + $0xe0] ss:$8 sps:$4 sm:$0xff]  }
  0x32   :  { %292 = vmatpush1.bf16.msra.mxu0 %v809_v5  ;;  %591 = vmatprep.subr.bf16.mxu1 %v852_v22  ;;  %v858_v29 = vld [vmem:[#allocation7 + $0x44] ss:$8 sps:$4 sm:$0xff]   ;;  %v831_v30 = vld [vmem:[#allocation5 + $0xd4] ss:$8 sps:$4 sm:$0xff]   ;;  %v860_v31 = vld [vmem:[#allocation7 + $0x40] ss:$8 sps:$4 sm:$0xff]  }
  0x33   :  { %293 = vmatprep.subr.bf16.mxu0 %v810_v6  ;;  %v833_v32 = vld [vmem:[#allocation5 + $0xd0] ss:$8 sps:$4 sm:$0xff]   ;;  %v861_v33 = vld [vmem:[#allocation7 + $0x34] ss:$8 sps:$4 sm:$0xff]   ;;  %v834_v34 = vld [vmem:[#allocation5 + $0xc4] ss:$8 sps:$4 sm:$0xff]  }
  0x34   :  { %v863_v35 = vld [vmem:[#allocation7 + $0x30] ss:$8 sps:$4 sm:$0xff]   ;;  %v836_v36 = vld [vmem:[#allocation5 + $0xc0] ss:$8 sps:$4 sm:$0xff]   ;;  %v864_v37 = vld [vmem:[#allocation7 + $0x24] ss:$8 sps:$4 sm:$0xff]  }
  0x35   :  { %592 = vmatpush1.bf16.msra.mxu1 %v854_v23  ;;  %v837_v38 = vld [vmem:[#allocation5 + $0xb4] ss:$8 sps:$4 sm:$0xff]   ;;  %v866_v39 = vld [vmem:[#allocation7 + $0x20] ss:$8 sps:$4 sm:$0xff]   ;;  %v839_v40 = vld [vmem:[#allocation5 + $0xb0] ss:$8 sps:$4 sm:$0xff]  }
  0x36   :  { %294 = vmatpush1.bf16.msra.mxu0 %v812_v7  ;;  %593 = vmatprep.subr.bf16.mxu1 %v855_v25  ;;  %v867_v41 = vld [vmem:[#allocation7 + $0x14] ss:$8 sps:$4 sm:$0xff]   ;;  %v840_v42 = vld [vmem:[#allocation5 + $0xa4] ss:$8 sps:$4 sm:$0xff]   ;;  %v869_v43 = vld [vmem:[#allocation7 + $0x10] ss:$8 sps:$4 sm:$0xff]  }
  0x37   :  { %295 = vmatprep.subr.bf16.mxu0 %v813_v8  ;;  %v842_v44 = vld [vmem:[#allocation5 + $0xa0] ss:$8 sps:$4 sm:$0xff]   ;;  %v870_v45 = vld [vmem:[#allocation7 + $0x4] ss:$8 sps:$4 sm:$0xff]   ;;  %v843_v46 = vld [vmem:[#allocation5 + $0x94] ss:$8 sps:$4 sm:$0xff]  }
  0x38   :  { %v872_v47 = vld [vmem:[#allocation7] ss:$8 sps:$4 sm:$0xff]   ;;  %v845_v48 = vld [vmem:[#allocation5 + $0x90] ss:$8 sps:$4 sm:$0xff]   ;;  %v873_v49 = vld [vmem:[#allocation7 + $0xf4] ss:$8 sps:$4 sm:$0xff]  }
  0x39   :  { %594 = vmatpush1.bf16.msra.mxu1 %v857_v27  ;;  %v846_v50 = vld [vmem:[#allocation5 + $0x84] ss:$8 sps:$4 sm:$0xff]   ;;  %v848_v51 = vld [vmem:[#allocation5 + $0x80] ss:$8 sps:$4 sm:$0xff]   ;;  %v875_v52 = vld [vmem:[#allocation7 + $0xf0] ss:$8 sps:$4 sm:$0xff]  }
  0x3a   :  { %296 = vmatpush1.bf16.msra.mxu0 %v815_v9  ;;  %595 = vmatprep.subr.bf16.mxu1 %v858_v29  ;;  %v1036_v54 = vld [vmem:[#allocation2 + $0x10] sm:$0xff]  ;;  %v876_v55 = vld [vmem:[#allocation7 + $0xe4] ss:$8 sps:$4 sm:$0xff]   ;;  %v1040_v57 = vld [vmem:[#allocation2 + $0x38] sm:$0xff] }
  0x3b   :  { %297 = vmatprep.subr.bf16.mxu0 %v816_v10  ;;  %v1038_v56 = vld [vmem:[#allocation2 + $0x28] sm:$0xff]  ;;  %v75_v58 = vpack.c.bf16 %v1036_v54, %v1034_v53  ;;  %v879_v61 = vld [vmem:[#allocation7 + $0xd4] ss:$8 sps:$4 sm:$0xff]   ;;  %v881_v62 = vld [vmem:[#allocation7 + $0xd0] ss:$8 sps:$4 sm:$0xff]  }
  0x3c   :  { %v878_v59 = vld [vmem:[#allocation7 + $0xe0] ss:$8 sps:$4 sm:$0xff]   ;;  %v78_v60 = vpack.c.bf16 %v1040_v57, %v1038_v56  ;;  %v1048_v0 = vld [vmem:[#allocation2 + $0x30] sm:$0xff]  ;;  %v882_v1 = vld [vmem:[#allocation7 + $0xc4] ss:$8 sps:$4 sm:$0xff]  }
  0x3d   :  { %596 = vmatpush1.bf16.msra.mxu1 %v860_v31  ;;  %v1046_v63 = vld [vmem:[#allocation2 + $0x20] sm:$0xff]  ;;  %v1050_v2 = vld [vmem:[#allocation2 + $0x48] sm:$0xff]  ;;  %v1052_v3 = vld [vmem:[#allocation2 + $0x58] sm:$0xff] }
  0x3e   :  { %298 = vmatpush1.bf16.msra.mxu0 %v818_v11  ;;  %597 = vmatprep.subr.bf16.mxu1 %v861_v33  ;;  %v77_v4 = vpack.c.bf16 %v1048_v0, %v1046_v63  ;;  %v884_v5 = vld [vmem:[#allocation7 + $0xc0] ss:$8 sps:$4 sm:$0xff]   ;;  %v80_v6 = vpack.c.bf16 %v1052_v3, %v1050_v2  ;;  %v885_v7 = vld [vmem:[#allocation7 + $0xb4] ss:$8 sps:$4 sm:$0xff]   ;;  %v887_v8 = vld [vmem:[#allocation7 + $0xb0] ss:$8 sps:$4 sm:$0xff]  }
  0x3f   :  { %299 = vmatprep.subr.bf16.mxu0 %v819_v12  ;;  %v1058_v9 = vld [vmem:[#allocation2 + $0x40] sm:$0xff]  ;;  %v1060_v10 = vld [vmem:[#allocation2 + $0x50] sm:$0xff]  ;;  %v1062_v11 = vld [vmem:[#allocation2 + $0x68] sm:$0xff] }
  0x40   :  { %v1064_v12 = vld [vmem:[#allocation2 + $0x78] sm:$0xff]  ;;  %v79_v15 = vpack.c.bf16 %v1060_v10, %v1058_v9  ;;  %v888_v20 = vld [vmem:[#allocation7 + $0xa4] ss:$8 sps:$4 sm:$0xff]   ;;  %v890_v21 = vld [vmem:[#allocation7 + $0xa0] ss:$8 sps:$4 sm:$0xff]  }
  0x41   :  { %598 = vmatpush1.bf16.msra.mxu1 %v863_v35  ;;  %v891_v22 = vld [vmem:[#allocation7 + $0x94] ss:$8 sps:$4 sm:$0xff]   ;;  %v893_v23 = vld [vmem:[#allocation7 + $0x90] ss:$8 sps:$4 sm:$0xff]   ;;  %v896_v25 = vld [vmem:[#allocation7 + $0x80] ss:$8 sps:$4 sm:$0xff]  }
  0x42   :  { %300 = vmatpush1.bf16.msra.mxu0 %v821_v16  ;;  %599 = vmatprep.subr.bf16.mxu1 %v864_v37  ;;  %v82_v16 = vpack.c.bf16 %v1064_v12, %v1062_v11 }
  0x43   :  { %301 = vmatprep.subr.bf16.mxu0 %v822_v17  ;;  %v1070_v17 = vld [vmem:[#allocation2 + $0x60] sm:$0xff] }
  0x45   :  { %600 = vmatpush1.bf16.msra.mxu1 %v866_v39 }
  0x46   :  { %302 = vmatpush1.bf16.msra.mxu0 %v824_v18  ;;  %601 = vmatprep.subr.bf16.mxu1 %v867_v41  ;;  %v1072_v18 = vld [vmem:[#allocation2 + $0x70] sm:$0xff] }
  0x47   :  { %303 = vmatprep.subr.bf16.mxu0 %v825_v19  ;;  %v81_v19 = vpack.c.bf16 %v1072_v18, %v1070_v17 }
  0x49   :  { %602 = vmatpush1.bf16.msra.mxu1 %v869_v43 }
  0x4a   :  { %304 = vmatpush2.bf16.msra.mxu0 %v827_v24  ;;  %603 = vmatprep.subr.bf16.mxu1 %v870_v45  ;;  %v894_v24 = vld [vmem:[#allocation7 + $0x84] ss:$8 sps:$4 sm:$0xff]  }
  0x4b   :  { %305 = vmatprep.subr.bf16.mxu0 %v828_v26  ;;  %v117_v26 = vlaneseq }
  0x4d   :  { %604 = vmatpush1.bf16.msra.mxu1 %v872_v47  ;;  %v1076_v27 = vshrl.u32 %v117_v26, 7 }
  0x4e   :  { %306 = vmatpush2.bf16.msra.mxu0 %v830_v28  ;;  %605 = vmatprep.subr.bf16.mxu1 %v873_v49 }
  0x4f   :  { %307 = vmatprep.subr.bf16.mxu0 %v831_v30  ;;  %v123_v28 = vsub.s32 1, %v1076_v27  ;;  %v119_v29 = vsub.s32 0, %v1076_v27  ;;  %v115_v30 = vld [vmem:[%s1139_s3] ss:$2 sm:$0x3] }
  0x51   :  { %606 = vmatpush2.bf16.msra.mxu1 %v875_v52  ;;  %v120_v33 = vrot.slane %v115_v30, %v119_v29 }
  0x52   :  { %308 = vmatpush2.bf16.msra.mxu0 %v833_v32  ;;  %607 = vmatprep.subr.bf16.mxu1 %v876_v55  ;;  %v124_v32 = vrot.slane %v115_v30, %v123_v28 }
  0x53   :  { %309 = vmatprep.subr.bf16.mxu0 %v834_v34 }
  0x55   :  { %608 = vmatpush2.bf16.msra.mxu1 %v878_v59 }
  0x56   :  { %310 = vmatpush2.bf16.msra.mxu0 %v836_v36  ;;  %609 = vmatprep.subr.bf16.mxu1 %v879_v61 }
  0x57   :  { %311 = vmatprep.subr.bf16.mxu0 %v837_v38 }
  0x59   :  { %610 = vmatpush2.bf16.msra.mxu1 %v881_v62 }
  0x5a   :  { %312 = vmatpush2.bf16.msra.mxu0 %v839_v40  ;;  %611 = vmatprep.subr.bf16.mxu1 %v882_v1 }
  0x5b   :  { %313 = vmatprep.subr.bf16.mxu0 %v840_v42 }
  0x5d   :  { %612 = vmatpush2.bf16.msra.mxu1 %v884_v5 }
  0x5e   :  { %314 = vmatpush2.bf16.msra.mxu0 %v842_v44  ;;  %613 = vmatprep.subr.bf16.mxu1 %v885_v7 }
  0x5f   :  { %315 = vmatprep.subr.bf16.mxu0 %v843_v46 }
  0x61   :  { %614 = vmatpush2.bf16.msra.mxu1 %v887_v8 }
  0x62   :  { %316 = vmatpush2.bf16.msra.mxu0 %v845_v48  ;;  %615 = vmatprep.subr.bf16.mxu1 %v888_v20 }
  0x63   :  { %317 = vmatprep.subr.bf16.mxu0 %v846_v50 }
  0x65   :  { %616 = vmatpush2.bf16.msra.mxu1 %v890_v21 }
  0x66   :  { %318 = vmatpush2.bf16.msra.mxu0 %v848_v51  ;;  %617 = vmatprep.subr.bf16.mxu1 %v891_v22 }
  0x69   :  { %320 = vmatmul.mubr.bf16.vlgmr.msra.gmra.mxu0 %v75_v58  ;;  %618 = vmatpush2.bf16.msra.mxu1 %v893_v23 }
  0x6a   :  { %329 = vmatprep.mubr.bf16.mxu0 %v78_v60  ;;  %619 = vmatprep.subr.bf16.mxu1 %v894_v24 }
  0x6d   :  { %620 = vmatpush2.bf16.msra.mxu1 %v896_v25 }
  0x71   :  { %330 = vmatmul.mubr.bf16.gmra.mxu0 %v77_v4 }
  0x72   :  { %339 = vmatprep.mubr.bf16.mxu0 %v80_v6 }
  0x79   :  { %340 = vmatmul.mubr.bf16.gmra.mxu0 %v79_v15 }
  0x7a   :  { %349 = vmatprep.mubr.bf16.mxu0 %v82_v16 }
  0x81   :  { %350 = vmatmul.mubr.bf16.gmra.mxu0 %v81_v19 }
 0x129   :  { %v321_v31 = vpop.f32.mrf.mxu0 }
 0x12a   :  { %v322_v38 = vadd.f32 %v321_v31, %v120_v33 }
 0x12b   :  { %v323_v34 = vpop.f32.mrf.mxu0 }
 0x12c   :  { %v324_v36 = vadd.f32 %v323_v34, %v124_v32  ;;  %v360_v45 = vmax.f32 %v322_v38, 0.0 }
 0x12d   :  { %v325_v35 = vpop.f32.mrf.mxu0 }
 0x12e   :  { %v326_v37 = vadd.f32 %v325_v35, %v120_v33  ;;  %v361_v43 = vmax.f32 %v324_v36, 0.0 }
 0x12f   :  { %v327_v39 = vpop.f32.mrf.mxu0 }
 0x130   :  { %v328_v40 = vadd.f32 %v327_v39, %v124_v32  ;;  %v362_v41 = vmax.f32 %v326_v37, 0.0 }
 0x131   :  { %v331_v42 = vpop.f32.mrf.mxu0 }
 0x132   :  { %v363_v44 = vmax.f32 %v328_v40, 0.0  ;;  %v376_v48 = vpack.c.bf16 %v362_v41, %v360_v45  ;;  %v332_v52 = vadd.f32 %v331_v42, %v120_v33 }
 0x133   :  { %v333_v46 = vpop.f32.mrf.mxu0 }
 0x134   :  { %v377_v47 = vpack.c.bf16 %v363_v44, %v361_v43  ;;  %v334_v50 = vadd.f32 %v333_v46, %v124_v32  ;;  %v364_v1 = vmax.f32 %v332_v52, 0.0  ;;  %v760_v46 = vld [vmem:[%s1139_s3 + $0x1] ss:$2 sm:$0x3]  ;;  %s990_s3 = smov [#allocation8]  }
 0x135   :  { %v335_v49 = vpop.f32.mrf.mxu0  ;;  %s715_s9 = sshll.u32 %s990_s3, 4  ;;  %s716_s9 = int_to_ptr.vmem [resolvable:$true] %s715_s9 }
 0x136   :  { %v336_v51 = vadd.f32 %v335_v49, %v120_v33  ;;  %621 = vmatprep.mubr.bf16.mxu1 %v377_v47  ;;  %v365_v61 = vmax.f32 %v334_v50, 0.0  ;;  %v1092_v47 = vrot.slane %v760_v46, %v119_v29  ;;  %s957_s10 = scalar_lea.vmem %s716_s9, 2048  ;;  %p962_p2 = scmp.lt.s32.totalorder %s716_s9, %s716_s9 }
 0x137   :  { %v337_v55 = vpop.f32.mrf.mxu0  ;;  %622 = vmatmul.mubr.bf16.vlgmr.msra.gmra.mxu1 %v376_v48  ;;  %p958_p1 = scmp.ne.s32.totalorder %s716_s9, %s957_s10  ;;  %p963_p3 = scmp.lt.s32.totalorder %s957_s10, %s957_s10 }
 0x138   :  { %v338_v58 = vadd.f32 %v337_v55, %v124_v32  ;;  %v366_v59 = vmax.f32 %v336_v51, 0.0 }
 0x139   :  { %v341_v60 = vpop.f32.mrf.mxu0  ;;  %p964_p4 = por %p963_p3, %p962_p2 }
 0x13a   :  { %v367_v62 = vmax.f32 %v338_v58, 0.0  ;;  %v378_v6 = vpack.c.bf16 %v366_v59, %v364_v1  ;;  %v342_v16 = vadd.f32 %v341_v60, %v120_v33 }
 0x13b   :  { %v343_v4 = vpop.f32.mrf.mxu0  ;;  %p965_p5 = pnand %p964_p4, %p958_p1 }
 0x13c   :  { %v379_v5 = vpack.c.bf16 %v367_v62, %v365_v61  ;;  %v344_v8 = vadd.f32 %v343_v4, %v124_v32  ;;  %v368_v25 = vmax.f32 %v342_v16, 0.0 }
 0x13d   :  { %v345_v7 = vpop.f32.mrf.mxu0 }
 0x13e   :  { %v346_v15 = vadd.f32 %v345_v7, %v120_v33  ;;  %631 = vmatprep.mubr.bf16.mxu1 %v379_v5  ;;  %v369_v23 = vmax.f32 %v344_v8, 0.0 }
 0x13f   :  { %v347_v19 = vpop.f32.mrf.mxu0  ;;  %632 = vmatmul.mubr.bf16.gmra.mxu1 %v378_v6 }
 0x140   :  { %v348_v20 = vadd.f32 %v347_v19, %v124_v32  ;;  %v370_v21 = vmax.f32 %v346_v15, 0.0 }
 0x141   :  { %v351_v22 = vpop.f32.mrf.mxu0 }
 0x142   :  { %v371_v24 = vmax.f32 %v348_v20, 0.0  ;;  %v380_v31 = vpack.c.bf16 %v370_v21, %v368_v25  ;;  %v352_v37 = vadd.f32 %v351_v22, %v120_v33 }
 0x143   :  { %v353_v26 = vpop.f32.mrf.mxu0 }
 0x144   :  { %v381_v30 = vpack.c.bf16 %v371_v24, %v369_v23  ;;  %v354_v35 = vadd.f32 %v353_v26, %v124_v32  ;;  %v372_v43 = vmax.f32 %v352_v37, 0.0 }
 0x145   :  { %v355_v34 = vpop.f32.mrf.mxu0 }
 0x146   :  { %v356_v36 = vadd.f32 %v355_v34, %v120_v33  ;;  %641 = vmatprep.mubr.bf16.mxu1 %v381_v30  ;;  %v373_v41 = vmax.f32 %v354_v35, 0.0  ;;  %v1096_v33 = vrot.slane %v760_v46, %v123_v28 }
 0x147   :  { %v357_v38 = vpop.f32.mrf.mxu0  ;;  %642 = vmatmul.mubr.bf16.gmra.mxu1 %v380_v31 }
 0x148   :  { %v358_v39 = vadd.f32 %v357_v38, %v124_v32  ;;  %v374_v40 = vmax.f32 %v356_v36, 0.0 }
 0x14a   :  { %v375_v42 = vmax.f32 %v358_v39, 0.0  ;;  %v382_v45 = vpack.c.bf16 %v374_v40, %v372_v43 }
 0x14c   :  { %v383_v44 = vpack.c.bf16 %v375_v42, %v373_v41 }
 0x14e   :  { %651 = vmatprep.mubr.bf16.mxu1 %v383_v44 }
 0x14f   :  { %652 = vmatmul.mubr.bf16.gmra.mxu1 %v382_v45 }
 0x1f7   :  { %v623_v32 = vpop.f32.mrf.mxu1 }
 0x1f8   :  { %v624_v48 = vadd.f32 %v623_v32, %v1092_v47 }
 0x1f9   :  { %v625_v49 = vpop.f32.mrf.mxu1 }
 0x1fa   :  { %v662_v50 = vmax.f32 %v624_v48, 0.0  ;;  %v626_v51 = vadd.f32 %v625_v49, %v1096_v33 }
 0x1fb   :  { %v627_v52 = vpop.f32.mrf.mxu1 }
 0x1fc   :  { %v678_v55 = vadd.f32 %v662_v50, %v1034_v53  ;;  %v663_v58 = vmax.f32 %v626_v51, 0.0  ;;  %v628_v59 = vadd.f32 %v627_v52, %v1092_v47 }
 0x1fd   :  { %v629_v60 = vpop.f32.mrf.mxu1 }
 0x1fe   :  { %694 = vst [vmem:[#allocation8] sm:$0xff] %v678_v55  ;;  %v679_v29 = vadd.f32 %v663_v58, %v1028_v13  ;;  %v664_v27 = vmax.f32 %v628_v59, 0.0  ;;  %v630_v28 = vadd.f32 %v629_v60, %v1096_v33 }
 0x1ff   :  { %v633_v61 = vpop.f32.mrf.mxu1 }
 0x200   :  { %695 = vst [vmem:[#allocation8 + $0x8] sm:$0xff] %v679_v29  ;;  %v680_v62 = vadd.f32 %v664_v27, %v1036_v54  ;;  %v665_v1 = vmax.f32 %v630_v28, 0.0  ;;  %v634_v4 = vadd.f32 %v633_v61, %v1092_v47 }
 0x201   :  { %v635_v5 = vpop.f32.mrf.mxu1 }
 0x202   :  { %696 = vst [vmem:[#allocation8 + $0x10] sm:$0xff] %v680_v62  ;;  %v681_v53 = vadd.f32 %v665_v1, %v1030_v14  ;;  %v666_v6 = vmax.f32 %v634_v4, 0.0  ;;  %v636_v7 = vadd.f32 %v635_v5, %v1096_v33 }
 0x203   :  { %v637_v8 = vpop.f32.mrf.mxu1 }
 0x204   :  { %697 = vst [vmem:[#allocation8 + $0x18] sm:$0xff] %v681_v53  ;;  %v682_v13 = vadd.f32 %v666_v6, %v1046_v63  ;;  %v667_v15 = vmax.f32 %v636_v7, 0.0  ;;  %v638_v16 = vadd.f32 %v637_v8, %v1092_v47 }
 0x205   :  { %v639_v19 = vpop.f32.mrf.mxu1 }
 0x206   :  { %698 = vst [vmem:[#allocation8 + $0x20] sm:$0xff] %v682_v13  ;;  %v683_v54 = vadd.f32 %v667_v15, %v1038_v56  ;;  %v668_v20 = vmax.f32 %v638_v16, 0.0  ;;  %v640_v21 = vadd.f32 %v639_v19, %v1096_v33 }
 0x207   :  { %v643_v22 = vpop.f32.mrf.mxu1 }
 0x208   :  { %699 = vst [vmem:[#allocation8 + $0x28] sm:$0xff] %v683_v54  ;;  %v684_v14 = vadd.f32 %v668_v20, %v1048_v0  ;;  %v669_v23 = vmax.f32 %v640_v21, 0.0  ;;  %v644_v24 = vadd.f32 %v643_v22, %v1092_v47 }
 0x209   :  { %v645_v25 = vpop.f32.mrf.mxu1 }
 0x20a   :  { %700 = vst [vmem:[#allocation8 + $0x30] sm:$0xff] %v684_v14  ;;  %v685_v63 = vadd.f32 %v669_v23, %v1040_v57  ;;  %v670_v26 = vmax.f32 %v644_v24, 0.0  ;;  %v646_v30 = vadd.f32 %v645_v25, %v1096_v33 }
 0x20b   :  { %v647_v31 = vpop.f32.mrf.mxu1 }
 0x20c   :  { %701 = vst [vmem:[#allocation8 + $0x38] sm:$0xff] %v685_v63  ;;  %v686_v56 = vadd.f32 %v670_v26, %v1058_v9  ;;  %v671_v34 = vmax.f32 %v646_v30, 0.0  ;;  %v648_v35 = vadd.f32 %v647_v31, %v1092_v47 }
 0x20d   :  { %v649_v36 = vpop.f32.mrf.mxu1 }
 0x20e   :  { %702 = vst [vmem:[#allocation8 + $0x40] sm:$0xff] %v686_v56  ;;  %v687_v0 = vadd.f32 %v671_v34, %v1050_v2  ;;  %v672_v37 = vmax.f32 %v648_v35, 0.0  ;;  %v650_v38 = vadd.f32 %v649_v36, %v1096_v33 }
 0x20f   :  { %v653_v39 = vpop.f32.mrf.mxu1 }
 0x210   :  { %703 = vst [vmem:[#allocation8 + $0x48] sm:$0xff] %v687_v0  ;;  %v688_v57 = vadd.f32 %v672_v37, %v1060_v10  ;;  %v673_v40 = vmax.f32 %v650_v38, 0.0  ;;  %v654_v41 = vadd.f32 %v653_v39, %v1092_v47 }
 0x211   :  { %v655_v42 = vpop.f32.mrf.mxu1 }
 0x212   :  { %704 = vst [vmem:[#allocation8 + $0x50] sm:$0xff] %v688_v57  ;;  %v689_v9 = vadd.f32 %v673_v40, %v1052_v3  ;;  %v674_v43 = vmax.f32 %v654_v41, 0.0  ;;  %v656_v44 = vadd.f32 %v655_v42, %v1096_v33 }
 0x213   :  { %v657_v45 = vpop.f32.mrf.mxu1 }
 0x214   :  { %705 = vst [vmem:[#allocation8 + $0x58] sm:$0xff] %v689_v9  ;;  %v690_v2 = vadd.f32 %v674_v43, %v1070_v17  ;;  %v675_v46 = vmax.f32 %v656_v44, 0.0  ;;  %v658_v32 = vadd.f32 %v657_v45, %v1092_v47 }
 0x215   :  { %v659_v48 = vpop.f32.mrf.mxu1 }
 0x216   :  { %706 = vst [vmem:[#allocation8 + $0x60] sm:$0xff] %v690_v2  ;;  %v691_v10 = vadd.f32 %v675_v46, %v1062_v11  ;;  %v676_v49 = vmax.f32 %v658_v32, 0.0  ;;  %v660_v50 = vadd.f32 %v659_v48, %v1096_v33 }
 0x218   :  { %707 = vst [vmem:[#allocation8 + $0x68] sm:$0xff] %v691_v10  ;;  %v692_v3 = vadd.f32 %v676_v49, %v1072_v18  ;;  %v677_v51 = vmax.f32 %v660_v50, 0.0 }
 0x21a   :  { %708 = vst [vmem:[#allocation8 + $0x70] sm:$0xff] %v692_v3  ;;  %v693_v52 = vadd.f32 %v677_v51, %v1064_v12 }
 0x21c   :  { %709 = vst [vmem:[#allocation8 + $0x78] sm:$0xff] %v693_v52 }
 0x21d   :  { %968 = shalt.err (!%p965_p5)
}
 0x21e   :  { %721 = dma.vmem_to_hbm [thread:$0]  %s716_s9, 2048, %s1140_s4, [#allocation4], %s987_s25, %s987_s25, %s988_s26  }
 0x21f   :  { %981 = dma.done.wait [#allocation4], 2048  }
 0x220   :  { %982 = vsyncadd [#allocation4], 4294965248 }
 0x221   :  { %725 = vsyncpa [#allocation3], 1 }
 0x222   :  { %726 = vsyncpa [#allocation6], 1 }
 0x223   :  { %727 = vsyncpa [#allocation4], 1 }

</bundles_post_ra>
